<compile_context>
chip_gen: v7x
topology: tpu7x:2x2x1
jax: 0.10.0
libtpu: 0.0.40
codegen_flags: <defaults>
</compile_context>

<pallas_src>
import functools

import jax
import jax.numpy as jnp
from jax import lax
from jax.experimental import pallas as pl
from jax.experimental.pallas import tpu as pltpu


def _gather_tokens_kernel(idx_ref, x_ref, o_ref, *, precision):
    """One-hot MXU gather.

    idx_ref: (BN, K, 1) int32  -- kept-token indices
    x_ref:   (BN, L, D)        -- token slab for BN batches
    o_ref:   (BN, K, D)        -- gathered tokens (exact output shape)
    """
    bn, k, _ = idx_ref.shape
    L = x_ref.shape[1]

    # onehot[b, k, l] = (idx[b, k] == l); compare stays int32, single cast to x dtype.
    token_ids = lax.broadcasted_iota(jnp.int32, (bn, k, L), 2)
    onehot = (idx_ref[...] == token_ids).astype(x_ref.dtype)          # (BN, K, L)

    # (K, L) @ (L, D) per batch on the MXU; f32 accumulation. HIGHEST precision
    # for f32 inputs keeps the one-hot selection exact (no bf16 truncation).
    gathered = jnp.einsum(
        "bkl,bld->bkd",
        onehot,
        x_ref[...],
        preferred_element_type=jnp.float32,
        precision=precision,
    )
    o_ref[...] = gathered.astype(o_ref.dtype)


def _vmem_budget_bytes():
    """Generation-aware VMEM budget: ~3/4 of capacity, capped at 100 MiB
    (~96 MiB on v5e/v6e's 128 MiB, ~48 MiB on v7x's 64 MiB per TC)."""
    try:
        cap = int(pltpu.get_tpu_info().vmem_capacity_bytes)
    except Exception:  # conservative fallback if the query is unavailable
        cap = 64 << 20
    return min((cap * 3) // 4, 100 << 20)


def _pick_bn(N, L, D, K, itemsize, vmem_budget_bytes):
    """Pick batch-block size BN against the VMEM budget, keeping grid >= 2 so the
    'parallel' batch axis can shard across v7x's two TensorCores."""
    k_eff = -(-K // 8) * 8                       # layout (sublane) padding of K
    per_b = (
        2 * L * D * itemsize                     # double-buffered x tile
        + 2 * K * D * itemsize                   # double-buffered out tile
        + 2 * K * 4                              # double-buffered idx tile (int32)
        + k_eff * L * itemsize                   # onehot intermediate (x dtype)
        + k_eff * L * 4                          # int32 iota + compare intermediate
        + k_eff * D * 4                          # f32 einsum accumulator
    )
    bn = max(1, min(N, vmem_budget_bytes // max(1, per_b)))
    bn = min(bn, max(1, N // 2))                 # grid >= 2 -> both v7x TCs busy
    return int(bn)


def _gather_tokens(x, idx):
    """x: (N, L, D); idx: (N, K) int32 keep-indices (CLS first, sorted).
    Returns x gathered along dim 1: (N, K, D)."""
    N, L, D = x.shape
    K = idx.shape[1]
    itemsize = jnp.dtype(x.dtype).itemsize
    idx3 = idx.astype(jnp.int32)[:, :, None]                 # (N, K, 1)

    budget = _vmem_budget_bytes()
    BN = _pick_bn(N, L, D, K, itemsize, budget)
    grid = (pl.cdiv(N, BN),)                                 # tail block is masked

    precision = (
        lax.Precision.HIGHEST if x.dtype == jnp.float32 else lax.Precision.DEFAULT
    )
    kernel = functools.partial(_gather_tokens_kernel, precision=precision)

    return pl.pallas_call(
        kernel,
        out_shape=jax.ShapeDtypeStruct((N, K, D), x.dtype),
        grid_spec=pltpu.PrefetchScalarGridSpec(
            num_scalar_prefetch=0,
            grid=grid,
            in_specs=[
                pl.BlockSpec((BN, K, 1), lambda n: (n, 0, 0)),
                pl.BlockSpec((BN, L, D), lambda n: (n, 0, 0)),
            ],
            out_specs=pl.BlockSpec((BN, K, D), lambda n: (n, 0, 0)),
        ),
        compiler_params=pltpu.CompilerParams(
            dimension_semantics=("parallel",),
            vmem_limit_bytes=int(budget),
        ),
    )(idx3, x)


def _keep_indices(key, N, L, keep_rate, token_shuffling):
    """Uniformly sample `keep` patch indices per batch (CLS index 0 prepended)."""
    _L = L - 1
    keep = int(_L * keep_rate)
    r = jax.random.uniform(key, (N, _L))
    # top_k on uniform randoms == uniform sample of `keep` indices w/o replacement.
    _, patch_mask = lax.top_k(r, keep)                       # (N, keep), in [0, _L)
    patch_mask = patch_mask.astype(jnp.int32) + 1            # skip CLS slot
    if not token_shuffling:
        patch_mask = jnp.sort(patch_mask, axis=1)
    cls_mask = jnp.zeros((N, 1), dtype=jnp.int32)
    return jnp.concatenate([cls_mask, patch_mask], axis=1)   # (N, keep + 1)


def patch_dropout(x, key, *, keep_rate=0.5, sampling="uniform",
                  token_shuffling=False, training=True, force_drop=False):
    """Functional equivalent of PatchDropout.forward. Always returns one array."""
    if (not training) and (not force_drop):
        return x
    if keep_rate == 1:
        return x
    if sampling != "uniform":
        raise NotImplementedError(f"PatchDropout does not support {sampling} sampling")

    N, L, D = x.shape
    idx = _keep_indices(key, N, L, keep_rate, token_shuffling)
    return _gather_tokens(x, idx)


if __name__ == "__main__":
    # Small shapes: batch=2, L=17 tokens (1 CLS + 16 patches), hidden D=128.
    N, L, D = 2, 17, 128
    keep_rate = 0.5

    root = jax.random.PRNGKey(0)
    k_x, k_mask = jax.random.split(root)
    x = jax.random.normal(k_x, (N, L, D), dtype=jnp.float32)

    out = patch_dropout(x, k_mask, keep_rate=keep_rate,
                        token_shuffling=False, training=True, force_drop=True)
    out = jax.block_until_ready(out)

    # Reference check: recompute the (deterministic) keep indices from the same
    # key and gather with plain JAX (same semantics as torch.gather along dim=1).
    idx = _keep_indices(k_mask, N, L, keep_rate, token_shuffling=False)
    K = idx.shape[1]
    ref = jnp.take_along_axis(
        x, jnp.broadcast_to(idx[:, :, None], (N, K, D)).astype(jnp.int32), axis=1
    )

    assert out.shape == (N, int((L - 1) * keep_rate) + 1, D)
    assert jnp.allclose(out, ref, rtol=1e-6, atol=1e-6), "Pallas gather mismatch vs reference"
    # CLS token preserved at position 0:
    assert jnp.allclose(out[:, 0, :], x[:, 0, :])
    # Eval / keep_rate==1 branches return the input unchanged (consistent signature).
    assert patch_dropout(x, k_mask, keep_rate=keep_rate, training=False).shape == x.shape
    assert patch_dropout(x, k_mask, keep_rate=1, training=True).shape == x.shape

    print("KERNEL_OK")
</pallas_src>

<mosaic_0001>
module attributes {stable_mosaic.version = 11 : i64} {
  func.func @_gather_tokens_kernel(%arg0: i32, %arg1: memref<1x9x1xi32, #tpu.memory_space<vmem>>, %arg2: memref<1x17x128xf32, #tpu.memory_space<vmem>>, %arg3: memref<1x9x128xf32, #tpu.memory_space<vmem>>) attributes {dimension_semantics = [#tpu.dimension_semantics<parallel>], iteration_bounds = array<i64: 2>, scalar_prefetch = 0 : i64, scratch_operands = 0 : i64, tpu.core_type = #tpu.core_type<tc>, window_params = [{transform_indices = @transform_0, window_bounds = array<i64: 1, 9, 1>}, {transform_indices = @transform_1, window_bounds = array<i64: 1, 17, 128>}, {transform_indices = @transform_2, window_bounds = array<i64: 1, 9, 128>}]} {
    %0 = tpu.iota {dimensions = array<i32: 2>} : vector<1x9x17xi32>
    %c0 = arith.constant 0 : index
    %c0_0 = arith.constant 0 : index
    %c0_1 = arith.constant 0 : index
    %1 = vector.load %arg1[%c0, %c0_0, %c0_1] : memref<1x9x1xi32, #tpu.memory_space<vmem>>, vector<1x9x1xi32>
    %2 = vector.broadcast %1 : vector<1x9x1xi32> to vector<1x9x17xi32>
    %3 = arith.cmpi eq, %2, %0 : vector<1x9x17xi32>
    %4 = arith.extui %3 : vector<1x9x17xi1> to vector<1x9x17xi32>
    %5 = arith.sitofp %4 : vector<1x9x17xi32> to vector<1x9x17xf32>
    %c0_2 = arith.constant 0 : index
    %c0_3 = arith.constant 0 : index
    %c0_4 = arith.constant 0 : index
    %6 = vector.load %arg2[%c0_2, %c0_3, %c0_4] : memref<1x17x128xf32, #tpu.memory_space<vmem>>, vector<1x17x128xf32>
    "tpu.trace_start"() <{level = 10 : i32, message = "bkl,bld->bkd"}> : () -> ()
    %cst = arith.constant dense<0.000000e+00> : vector<1x9x128xf32>
    %7 = tpu.matmul %5, %6, %cst {dimension_numbers = #tpu.dot_dimension_numbers<[2], [1], [1], [2], [0, 0, 0, 1, 1, 2], [0], [0]>, precision = #tpu.contract_precision<fp32>} : vector<1x9x17xf32>, vector<1x17x128xf32>, vector<1x9x128xf32> -> vector<1x9x128xf32>
    "tpu.trace_stop"() : () -> ()
    %c0_5 = arith.constant 0 : index
    %c0_6 = arith.constant 0 : index
    %c0_7 = arith.constant 0 : index
    %8 = vector.load %arg3[%c0_5, %c0_6, %c0_7] : memref<1x9x128xf32, #tpu.memory_space<vmem>>, vector<1x9x128xf32>
    tpu.vector_store %arg3[%c0_5, %c0_6, %c0_7], %7 {strides = array<i32>} : memref<1x9x128xf32, #tpu.memory_space<vmem>>, vector<1x9x128xf32>,
    return
  }
  func.func @transform_0(%arg0: i32) -> (i32, i32, i32) {
    %c0_i32 = arith.constant 0 : i32
    %c0_i32_0 = arith.constant 0 : i32
    %c0_i32_1 = arith.constant 0 : i32
    return %arg0, %c0_i32, %c0_i32_0 : i32, i32, i32
  }
  func.func @transform_1(%arg0: i32) -> (i32, i32, i32) {
    %c0_i32 = arith.constant 0 : i32
    %c0_i32_0 = arith.constant 0 : i32
    %c0_i32_1 = arith.constant 0 : i32
    return %arg0, %c0_i32, %c0_i32_0 : i32, i32, i32
  }
  func.func @transform_2(%arg0: i32) -> (i32, i32, i32) {
    %c0_i32 = arith.constant 0 : i32
    %c0_i32_0 = arith.constant 0 : i32
    %c0_i32_1 = arith.constant 0 : i32
    return %arg0, %c0_i32, %c0_i32_0 : i32, i32, i32
  }
}

</mosaic_0001>

<bundles_post_ra>
// kernel: tpu_custom_call.1
= control target key start
LH: loop header
LB: loop body
LE: loop exit
PB: predicated region body
PF: predicated region fallthrough
CT: control target
= control target key end

     0   :  { %s955_s9 = smov 0   ;;  %s1008_s0 = inlined_call_operand.vmem [shape: s32[2,9,1], index: 0, kind: input, shape index: {}]   ;;  %s1009_s1 = inlined_call_operand.vmem [shape: f32[2,17,128], index: 1, kind: input, shape index: {}]   ;;  %s1010_s2 = inlined_call_operand.vmem [shape: f32[2,9,128], index: 2, kind: output, shape index: {}]  }
   0x1 LB: > { %s778_s10 = sadd.s32 4294967295, %s936_s9   ;;  %p782_p0 = scmp.ge.s32.totalorder %s936_s9, 1  ;;  %s936_s9 = sphi %s955_s9, %s12_s9  }
   0x2   : > { %p122_p1 = scmp.lt.s32.totalorder %s936_s9, 3 }
   0x4   : > { %p123_p2 = pnand %p782_p0, %p122_p1 }
   0x5   : > { %p149_p3 = scmp.lt.s32.totalorder (!%p123_p2), %s778_s10, 1  ;;  %v938_v0 = vmov (!%p123_p2), 0   ;;  %vm190_vm0 = vcmask (!%p123_p2), 1040384   ;;  %v164_v22 = vlaneseq (!%p123_p2)  ;;  %vm183_vm1 = vcmask (!%p123_p2), 138240  }
   0x6   : > { %126 = sbr.rel (%p123_p2) target bundleno = 392 (0x188), region = 28  ;;  %929 = vset.pattern.permute.xlu0 (!%p123_p2), %v938_v0  ;;  %v939_v26 = vmov (!%p123_p2), 0.0  }
   0x7   : > { %v165_v23 = vand.u32 (!%p123_p2), 127, %v164_v22 }
   0xd   : > { %s1012_s10 = smov (!%p149_p3, %s778_s10), 1 }
   0xe   : > { %s798_s11 = sshll.u32 %s1012_s10, 4  ;;  %s918_s12 = smul.u32 24, %s1012_s10 }
   0xf   : > { %s153_s15 = scalar_lea.vmem %s1008_s0, %s798_s11  ;;  %s163_s21 = scalar_lea.vmem %s1010_s2, %s798_s11 }
  0x10   : > { %s158_s18 = scalar_lea.vmem %s1009_s1, %s918_s12  ;;  %v166_v1 = vld [vmem:[%s153_s15] sm:$0xff]  ;;  %v167_v8 = vld [vmem:[%s153_s15 + $0x8] sm:$0x1] }
  0x11   : > { %v180_v2 = vld [vmem:[%s158_s18] sm:$0xff]  ;;  %v181_v3 = vld [vmem:[%s158_s18 + $0x8] sm:$0xff]  ;;  %v182_v4 = vld [vmem:[%s158_s18 + $0x10] sm:$0x1]  ;;  %169 = vperm.xlu0 %929, %v166_v1  }
  0x12   : > { %v192_v5 = vsel %vm190_vm0, %v182_v4, 0  ;;  %v195_v6 = vand.u32 4294901760, %v180_v2  ;;  %v198_v7 = vand.u32 4294901760, %v181_v3 }
  0x13   : > { %v977_v10 = vand.u32 4294901760, %v192_v5 }
  0x14   : > { %v975_v9 = vpack.c.bf16 %v198_v7, %v195_v6  ;;  %v284_v11 = vsub.f32 %v180_v2, %v195_v6  ;;  %v291_v12 = vsub.f32 %v181_v3, %v198_v7 }
  0x15   : > { %172 = vperm.xlu0 %929, %v167_v8   ;;  %v298_v25 = vsub.f32 %v192_v5, %v977_v10 }
  0x16   : > { %897 = vmatprep.subr.bf16.mxu0 %v975_v9  ;;  %885 = vmatprep.subr.bf16.mxu1 %v975_v9  ;;  %v285_v13 = vand.u32 4294901760, %v284_v11  ;;  %v292_v14 = vand.u32 4294901760, %v291_v12  ;;  %v892_v21 = vpack.c.bf16 %v291_v12, %v284_v11 }
  0x17   : > { %899 = vmatpush3.bf16.msra.mxu0 %v975_v9  ;;  %887 = vmatpush3.bf16.msra.mxu1 %v975_v9  ;;  %v299_v33 = vand.u32 4294901760, %v298_v25 }
  0x18   : > { %861 = vmatprep.subr.mxu0 %v977_v10  ;;  %834 = vmatprep.subr.mxu1 %v977_v10  ;;  %v900_v15 = vpack.c.bf16 %v292_v14, %v285_v13  ;;  %v286_v16 = vsub.f32 %v284_v11, %v285_v13  ;;  %v293_v17 = vsub.f32 %v291_v12, %v292_v14 }
  0x19   : > { %v300_v39 = vsub.f32 %v298_v25, %v299_v33 }
  0x1a   : > { %v287_v18 = vand.u32 4294901760, %v286_v16  ;;  %v294_v19 = vand.u32 4294901760, %v293_v17 }
  0x1b   : > { %862 = vmatpush3.msra.mxu0 %v977_v10  ;;  %835 = vmatpush3.msra.mxu1 %v977_v10  ;;  %v301_v42 = vand.u32 4294901760, %v300_v39 }
  0x1c   : > { %901 = vmatprep.subr.bf16.mxu0 %v900_v15  ;;  %v888_v20 = vpack.c.bf16 %v294_v19, %v287_v18 }
  0x1e   : > { %889 = vmatprep.subr.bf16.mxu1 %v888_v20 }
  0x90   : > { %v170_v24 = vpop.permute.xlu0 %169 }
  0x91   : > { %vm174_vm2 = vcmp.eq.s32.totalorder %v170_v24, %v165_v23 }
  0x92   : > { %v788_v27 = vsel %vm174_vm2, 1.0, %v939_v26 }
  0x93   : > { %v185_v28 = vsel %vm183_vm1, %v788_v27, 0 }
  0x94   : > { %v263_v29 = vsub.f32 %v185_v28, %v185_v28  ;;  %v173_v30 = vpop.permute.xlu0 %172 }
  0x95   : > { %vm175_vm3 = vcmp.eq.s32.totalorder %v173_v30, %v165_v23 }
  0x96   : > { %v789_v31 = vsel %vm175_vm3, 1.0, %v939_v26  ;;  %v264_v32 = vand.u32 4294901760, %v263_v29 }
  0x97   : > { %v188_v34 = vsel %vm183_vm1, %v789_v31, 0 }
  0x98   : > { %v273_v35 = vsub.f32 %v188_v34, %v188_v34  ;;  %863 = vmatprep.mubr.f32.mxu0 %v264_v32  ;;  %v265_v36 = vsub.f32 %v263_v29, %v264_v32 }
  0x9a   : > { %v266_v37 = vand.u32 4294901760, %v265_v36  ;;  %v274_v38 = vand.u32 4294901760, %v273_v35 }
  0x9c   : > { %836 = vmatprep.mubr.f32.mxu1 %v266_v37  ;;  %864 = vmatmul.mubr.f32.vlgmr.msra.gmra.mrb[0].mxu0 %v274_v38  ;;  %v275_v40 = vsub.f32 %v273_v35, %v274_v38 }
  0x9d   : > { %872 = vmatprep.mubr.msk.f32.mxu0 %vm183_vm1, %v788_v27  ;;  %903 = vmatpush3.bf16.msra.mxu0 %v900_v15 }
  0x9e   : > { %v276_v41 = vand.u32 4294901760, %v275_v40  ;;  %870 = vmatprep.subr.mxu0 %v299_v33 }
  0xa0   : > { %837 = vmatmul.mubr.f32.vlgmr.msra.gmra.mrb[0].mxu1 %v276_v41 }
  0xa1   : > { %891 = vmatpush3.bf16.msra.mxu1 %v888_v20  ;;  %845 = vmatprep.mubr.msk.f32.mxu1 %vm183_vm1, %v788_v27 }
  0xa2   : > { %843 = vmatprep.subr.mxu1 %v301_v42  ;;  %871 = vmatpush3.msra.mxu0 %v299_v33 }
  0xa3   : > { %905 = vmatprep.subr.bf16.mxu0 %v975_v9 }
  0xa4   : > { %873 = vmatmul.mubr.msk.f32.vlgmr.msra.gmra.mrb[0].mxu0 %vm183_vm1, %v789_v31 }
  0xa5   : > { %844 = vmatpush3.msra.mxu1 %v301_v42  ;;  %881 = vmatprep.mubr.msk.f32.mxu0 %vm183_vm1, %v788_v27 }
  0xa6   : > { %893 = vmatprep.subr.bf16.mxu1 %v892_v21  ;;  %907 = vmatpush3.bf16.msra.mxu0 %v975_v9 }
  0xa7   : > { %879 = vmatprep.subr.mxu0 %v977_v10 }
  0xa8   : > { %846 = vmatmul.mubr.msk.f32.vlgmr.msra.gmra.mrb[0].mxu1 %vm183_vm1, %v789_v31 }
  0xa9   : > { %895 = vmatpush3.bf16.msra.mxu1 %v892_v21  ;;  %854 = vmatprep.mubr.f32.mxu1 %v263_v29 }
  0xaa   : > { %852 = vmatprep.subr.mxu1 %v298_v25  ;;  %880 = vmatpush3.msra.mxu0 %v977_v10 }
  0xac   : > { %882 = vmatmul.mubr.msk.f32.vlgmr.msra.gmra.mrb[0].mxu0 %vm183_vm1, %v789_v31 }
  0xad   : > { %853 = vmatpush3.msra.mxu1 %v298_v25 }
  0xb0   : > { %855 = vmatmul.mubr.f32.vlgmr.msra.gmra.mrb[0].mxu1 %v273_v35 }
 0x17f   : > { %v883_v43 = vpop.f32.mrb[0].mxu0 }
 0x180   : > { %v699_v44 = vpop.f32.mrb[1].mxu0 }
 0x183   : > { %v856_v45 = vpop.f32.mrb[0].mxu1 }
 0x184   : > { %v908_v46 = vadd.f32 %v883_v43, %v856_v45  ;;  %v448_v47 = vpop.f32.mrb[1].mxu1 }
 0x185   : > { %v909_v48 = vadd.f32 %v699_v44, %v448_v47 }
 0x186   : > { %710 = vst [vmem:[%s163_s21 + $0x8] sm:$0x1] %v908_v46 }
 0x187   : > { %709 = vst [vmem:[%s163_s21] sm:$0xff] %v909_v48 }
 0x188 PF: > { %s12_s9 = sadd.s32 1, %s936_s9  }
 0x189   : > { %p9_p4 = scmp.ge.s32.totalorder %s12_s9, 4  }
 0x18b   :  { %11 = sbr.rel (!%p9_p4) target bundleno = 1 (0x1), region = 61 }

</bundles_post_ra>
